<compile_context>
chip_gen: v7x
topology: tpu7x:2x2x1
jax: 0.10.0
libtpu: 0.0.40
codegen_flags: <defaults>
</compile_context>

<pallas_src>
import numpy as np
import jax
import jax.numpy as jnp
from jax.experimental import pallas as pl
from jax.experimental.pallas import tpu as pltpu

NOISE_CHANNELS = 8
MAX_POSITIONS = 10000


# ------------------------------ fused kernel ------------------------------- #
def amed_kernel(x_ref, w0_ref, b0_ref, wzr_ref, bias_ref, r_ref):
    """One grid step = one batch tile.

    x_ref    : [tb, Din]  flattened unet-bottleneck batch tile (f32 or bf16)
    w0_ref   : [Din, H]   enc_layer0 weight^T (compute dtype)
    b0_ref   : [1, H]     enc_layer0 bias (f32)
    wzr_ref  : [H, P]     fused (enc_layer1^T @ fc_r_z-rows) weight (compute dtype)
    bias_ref : [1, P]     effective bias: b1@wrz + fc_r bias + time-embedding logits
    r_ref    : [tb, P]    sigmoid output tile (f32)
    """
    f32 = jnp.float32

    def sigmoid(v):
        # tanh-based sigmoid: transcendental goes to the EUP slot, no VALU divide.
        return 0.5 * jnp.tanh(0.5 * v) + 0.5

    # enc_layer0 + SiLU (f32 MXU accumulation, f32 epilogue).
    h = jnp.dot(x_ref[...], w0_ref[...], preferred_element_type=f32) + b0_ref[...]
    h = h * sigmoid(h)                                                  # [tb, H]

    # fused enc_layer1 -> fc_r (z-rows) + hoisted bias, then sigmoid.
    logits = jnp.dot(h.astype(wzr_ref.dtype), wzr_ref[...],
                     preferred_element_type=f32) + bias_ref[...]        # [tb, P]
    r_ref[...] = sigmoid(logits).astype(r_ref.dtype)


# ------------------------- deterministic param init ------------------------ #
def weight_init(key, shape, mode, fan_in, fan_out):
    if mode == "kaiming_normal":
        return np.sqrt(1.0 / fan_in) * jax.random.normal(key, shape, dtype=jnp.float32)
    if mode == "kaiming_uniform":
        return np.sqrt(3.0 / fan_in) * (jax.random.uniform(key, shape, dtype=jnp.float32) * 2 - 1)
    if mode == "xavier_normal":
        return np.sqrt(2.0 / (fan_in + fan_out)) * jax.random.normal(key, shape, dtype=jnp.float32)
    if mode == "xavier_uniform":
        return np.sqrt(6.0 / (fan_in + fan_out)) * (jax.random.uniform(key, shape, dtype=jnp.float32) * 2 - 1)
    raise ValueError(f'Invalid init mode "{mode}"')


def make_linear_params(key, in_features, out_features, bias=True,
                       init_mode="kaiming_normal", init_weight=1.0, init_bias=0.0):
    kw, kb = jax.random.split(key)
    w = weight_init(kw, (out_features, in_features), init_mode,
                    in_features, out_features) * init_weight
    b = (weight_init(kb, (out_features,), init_mode,
                     in_features, out_features) * init_bias) if bias else None
    return w, b


def make_amed_params(key, hidden_dim=128, bottleneck_input_dim=64,
                     bottleneck_output_dim=4, noise_channels=NOISE_CHANNELS,
                     num_points=2):
    k0, k1, k2, k3 = jax.random.split(key, 4)
    return {
        "map_layer0": make_linear_params(k0, noise_channels, noise_channels,
                                         init_mode="xavier_uniform"),
        "enc_layer0": make_linear_params(k1, bottleneck_input_dim, hidden_dim),
        "enc_layer1": make_linear_params(k2, hidden_dim, bottleneck_output_dim),
        "fc_r": make_linear_params(k3, 2 * noise_channels + bottleneck_output_dim,
                                   num_points),
    }


def prepare_params(params, bottleneck_output_dim=4, noise_channels=NOISE_CHANNELS,
                   compute_dtype=jnp.float32):
    """One-time (outside the hot path) re-layout + algebraic folding:
      * weights transposed to (in, out) so the kernel runs plain (M,K)@(K,N),
      * fc_r weight split along its concat column groups (concat eliminated),
      * enc_layer1 folded into the z-rows of fc_r (no nonlinearity in between),
      * matmul operands optionally cast to bf16 (accumulation stays f32)."""
    f32 = jnp.float32
    wm, bm = params["map_layer0"]   # [C, C],   [C]
    w0, b0 = params["enc_layer0"]   # [H, Din], [H]
    w1, b1 = params["enc_layer1"]   # [Z, H],   [Z]
    wr, br = params["fc_r"]         # [P, Z+2C],[P]
    C, Z = noise_channels, bottleneck_output_dim
    P = wr.shape[0]

    def vec(b, n):
        return jnp.zeros((n,), f32) if b is None else jnp.asarray(b, f32).reshape(n)

    wr_t = jnp.asarray(wr, f32).T                         # [Z + 2C, P]
    wrz, wrc, wrn = wr_t[:Z], wr_t[Z:Z + C], wr_t[Z + C:Z + 2 * C]

    w1_t = jnp.asarray(w1, f32).T                         # [H, Z]
    w_zr = w1_t @ wrz                                     # [H, P]  fused weight
    b_zr = vec(b1, w1.shape[0]) @ wrz                     # [P]

    return {
        # time-embedding head (stays f32; O(1) scalar work done in the wrapper):
        "wm_t": jnp.asarray(wm, f32).T,                   # [C, C]
        "bm": vec(bm, wm.shape[0]),                       # [C]
        "wrc": wrc, "wrn": wrn,                           # [C, P] each
        # kernel operands:
        "w0_t": jnp.asarray(w0, f32).T.astype(compute_dtype),   # [Din, H]
        "b0": vec(b0, w0.shape[0]).reshape(1, -1),               # [1, H] (f32)
        "w_zr": w_zr.astype(compute_dtype),                      # [H, P]
        # static part of the effective output bias:
        "b_base": b_zr + vec(br, P),                       # [P] (f32)
        "compute_dtype": compute_dtype,
    }


# ------------------------------ fused forward ------------------------------ #
def amed_predictor_forward(prepared, unet_bottleneck, t_cur, t_next,
                           noise_channels=NOISE_CHANNELS,
                           max_positions=MAX_POSITIONS,
                           block_batch=512):
    f32 = jnp.float32
    compute_dtype = prepared["compute_dtype"]
    w0_t, b0, w_zr = prepared["w0_t"], prepared["b0"], prepared["w_zr"]
    P = w_zr.shape[1]

    x = unet_bottleneck.reshape(unet_bottleneck.shape[0], -1).astype(compute_dtype)
    B, in_dim = x.shape

    # ---- batch-independent time-embedding head (hoisted out of the grid loop).
    # Flipped positional embedding [sin(t*f) | cos(t*f)] for the two scalar times
    # (PositionalEmbedding endpoint=True + the reshape/flip in the torch forward).
    half = noise_channels // 2
    freqs = (1.0 / max_positions) ** (jnp.arange(half, dtype=f32) / (half - 1))
    t2 = jnp.stack([jnp.asarray(t_cur, f32).reshape(()),
                    jnp.asarray(t_next, f32).reshape(())])
    tf = t2[:, None] * freqs[None, :]                                  # [2, half]
    emb_flip = jnp.concatenate([jnp.sin(tf), jnp.cos(tf)], axis=1)     # [2, C]
    e = emb_flip @ prepared["wm_t"] + prepared["bm"]                   # map_layer0
    e = e * jax.nn.sigmoid(e)                                          # SiLU
    e_logit = e[0] @ prepared["wrc"] + e[1] @ prepared["wrn"]          # [P]
    eff_bias = (prepared["b_base"] + e_logit).reshape(1, P).astype(f32)

    # ---- batch tiling: 8-aligned, large tiles, but keep >= 2 tiles when B > 8
    # so the "parallel" axis can shard across v7x's two TensorCores.
    rnd8 = lambda n: ((n + 7) // 8) * 8
    tb = max(8, min(block_batch, rnd8(pl.cdiv(B, 2))))
    n_tiles = pl.cdiv(B, tb)   # partial last block handled by Pallas (no jnp.pad)

    full = lambda i: (0, 0)    # weights / biases: grid-resident
    tile = lambda i: (i, 0)    # batch-tiled arrays

    r = pl.pallas_call(
        amed_kernel,
        out_shape=jax.ShapeDtypeStruct((B, P), jnp.float32),
        grid=(n_tiles,),
        in_specs=[
            pl.BlockSpec((tb, in_dim), tile),
            pl.BlockSpec(w0_t.shape, full),
            pl.BlockSpec(b0.shape, full),
            pl.BlockSpec(w_zr.shape, full),
            pl.BlockSpec(eff_bias.shape, full),
        ],
        out_specs=pl.BlockSpec((tb, P), tile),
        compiler_params=pltpu.CompilerParams(
            dimension_semantics=("parallel",),   # batch tiles split across TCs (v7x)
        ),
    )(x, w0_t, b0, w_zr, eff_bias)
    return r


# ------------------------- plain-JAX reference forward ---------------------- #
def amed_predictor_ref(params, unet_bottleneck, t_cur, t_next,
                       noise_channels=NOISE_CHANNELS, max_positions=MAX_POSITIONS):
    def pos_emb_flipped(t):
        half = noise_channels // 2
        freqs = jnp.arange(half, dtype=jnp.float32) / (half - 1)      # endpoint=True
        freqs = (1.0 / max_positions) ** freqs
        x = jnp.reshape(t, (1,)).astype(jnp.float32)[:, None] * freqs[None, :]
        e = jnp.concatenate([jnp.cos(x), jnp.sin(x)], axis=1)         # [1, C]
        e = jnp.flip(e.reshape(1, 2, -1), axis=1).reshape(1, noise_channels)
        return e

    silu = lambda v: v * jax.nn.sigmoid(v)
    wm, bm = params["map_layer0"]
    w0, b0 = params["enc_layer0"]
    w1, b1 = params["enc_layer1"]
    wr, br = params["fc_r"]

    B = unet_bottleneck.shape[0]
    emb = jnp.tile(silu(pos_emb_flipped(t_cur) @ wm.T + bm), (B, 1))
    emb1 = jnp.tile(silu(pos_emb_flipped(t_next) @ wm.T + bm), (B, 1))
    emb = jnp.concatenate([emb, emb1], axis=1)

    x = unet_bottleneck.reshape(B, -1).astype(jnp.float32)
    x = silu(x @ w0.T + b0)
    x = x @ w1.T + b1
    out = jnp.concatenate([x, emb], axis=1)
    return jax.nn.sigmoid(out @ wr.T + br)


# ---------------------------------- main ----------------------------------- #
if __name__ == "__main__":
    key = jax.random.PRNGKey(0)
    k_x, k_p, k_x2 = jax.random.split(key, 3)

    # Small shapes consistent with the module defaults.
    batch = 4
    hidden_dim = 128
    bottleneck_input_dim = 64
    bottleneck_output_dim = 4
    noise_channels = NOISE_CHANNELS
    num_points = 2

    # unet bottleneck feature map [B, 4, 4, 4] -> flattened to 64 features.
    unet_bottleneck = jax.random.normal(k_x, (batch, 4, 4, 4), dtype=jnp.float32)
    t_cur = jnp.float32(2.5)
    t_next = jnp.float32(1.25)

    params = make_amed_params(k_p, hidden_dim, bottleneck_input_dim,
                              bottleneck_output_dim, noise_channels, num_points)

    # --- f32 path, tight tolerance, small batch (launch-latency regime). ---
    prepared_f32 = prepare_params(params, bottleneck_output_dim, noise_channels,
                                  compute_dtype=jnp.float32)
    r = amed_predictor_forward(prepared_f32, unet_bottleneck, t_cur, t_next)
    r = jax.block_until_ready(r)
    assert r.shape == (batch, num_points)
    r_ref = amed_predictor_ref(params, unet_bottleneck, t_cur, t_next)
    np.testing.assert_allclose(np.asarray(r), np.asarray(r_ref),
                               rtol=1e-4, atol=1e-4)

    # --- bf16 operands (halves HBM read traffic on x), ragged larger batch
    #     exercising multi-tile + partial-last-block handling. ---
    batch_big = 300
    x_big = jax.random.normal(k_x2, (batch_big, 4, 4, 4), dtype=jnp.float32)
    prepared_bf16 = prepare_params(params, bottleneck_output_dim, noise_channels,
                                   compute_dtype=jnp.bfloat16)
    r_big = amed_predictor_forward(prepared_bf16, x_big, t_cur, t_next)
    r_big = jax.block_until_ready(r_big)
    assert r_big.shape == (batch_big, num_points)
    r_big_ref = amed_predictor_ref(params, x_big, t_cur, t_next)
    np.testing.assert_allclose(np.asarray(r_big), np.asarray(r_big_ref),
                               rtol=3e-2, atol=3e-2)

    print("KERNEL_OK")
</pallas_src>

<mosaic_0001>
module attributes {stable_mosaic.version = 11 : i64} {
  func.func @amed_kernel(%arg0: i32, %arg1: memref<8x64xf32, #tpu.memory_space<vmem>>, %arg2: memref<64x128xf32, #tpu.memory_space<vmem>>, %arg3: memref<1x128xf32, #tpu.memory_space<vmem>>, %arg4: memref<128x2xf32, #tpu.memory_space<vmem>>, %arg5: memref<1x2xf32, #tpu.memory_space<vmem>>, %arg6: memref<8x2xf32, #tpu.memory_space<vmem>>) attributes {dimension_semantics = [#tpu.dimension_semantics<parallel>], iteration_bounds = array<i64: 1>, scalar_prefetch = 0 : i64, scratch_operands = 0 : i64, tpu.core_type = #tpu.core_type<tc>, window_params = [{transform_indices = @transform_0, window_bounds = array<i64: 8, 64>}, {pipeline_mode = #tpu.pipeline_mode<synchronous>, transform_indices = @transform_1, window_bounds = array<i64: 64, 128>}, {pipeline_mode = #tpu.pipeline_mode<synchronous>, transform_indices = @transform_2, window_bounds = array<i64: 1, 128>}, {pipeline_mode = #tpu.pipeline_mode<synchronous>, transform_indices = @transform_3, window_bounds = array<i64: 128, 2>}, {pipeline_mode = #tpu.pipeline_mode<synchronous>, transform_indices = @transform_4, window_bounds = array<i64: 1, 2>}, {transform_indices = @transform_5, window_bounds = array<i64: 8, 2>}]} {
    %c0 = arith.constant 0 : index
    %c0_0 = arith.constant 0 : index
    %0 = vector.load %arg1[%c0, %c0_0] : memref<8x64xf32, #tpu.memory_space<vmem>>, vector<8x64xf32>
    %c0_1 = arith.constant 0 : index
    %c0_2 = arith.constant 0 : index
    %1 = vector.load %arg2[%c0_1, %c0_2] : memref<64x128xf32, #tpu.memory_space<vmem>>, vector<64x128xf32>
    %cst = arith.constant dense<0.000000e+00> : vector<8x128xf32>
    %2 = tpu.matmul %0, %1, %cst {dimension_numbers = #tpu.dot_dimension_numbers<[1], [0], [0], [1], [0, 0, 1, 1], [], []>} : vector<8x64xf32>, vector<64x128xf32>, vector<8x128xf32> -> vector<8x128xf32>
    %c0_3 = arith.constant 0 : index
    %c0_4 = arith.constant 0 : index
    %3 = vector.load %arg3[%c0_3, %c0_4] : memref<1x128xf32, #tpu.memory_space<vmem>>, vector<1x128xf32>
    %4 = vector.broadcast %3 : vector<1x128xf32> to vector<8x128xf32>
    %5 = arith.addf %2, %4 : vector<8x128xf32>
    %cst_5 = arith.constant 5.000000e-01 : f32
    %6 = vector.broadcast %cst_5 : f32 to vector<8x128xf32>
    %7 = arith.mulf %6, %5 : vector<8x128xf32>
    %8 = math.tanh %7 : vector<8x128xf32>
    %cst_6 = arith.constant 5.000000e-01 : f32
    %9 = vector.broadcast %cst_6 : f32 to vector<8x128xf32>
    %10 = arith.mulf %9, %8 : vector<8x128xf32>
    %cst_7 = arith.constant 5.000000e-01 : f32
    %11 = vector.broadcast %cst_7 : f32 to vector<8x128xf32>
    %12 = arith.addf %10, %11 : vector<8x128xf32>
    %13 = arith.mulf %5, %12 : vector<8x128xf32>
    %c0_8 = arith.constant 0 : index
    %c0_9 = arith.constant 0 : index
    %14 = vector.load %arg4[%c0_8, %c0_9] : memref<128x2xf32, #tpu.memory_space<vmem>>, vector<128x2xf32>
    %cst_10 = arith.constant dense<0.000000e+00> : vector<8x2xf32>
    %15 = tpu.matmul %13, %14, %cst_10 {dimension_numbers = #tpu.dot_dimension_numbers<[1], [0], [0], [1], [0, 0, 1, 1], [], []>} : vector<8x128xf32>, vector<128x2xf32>, vector<8x2xf32> -> vector<8x2xf32>
    %c0_11 = arith.constant 0 : index
    %c0_12 = arith.constant 0 : index
    %16 = vector.load %arg5[%c0_11, %c0_12] : memref<1x2xf32, #tpu.memory_space<vmem>>, vector<1x2xf32>
    %17 = vector.broadcast %16 : vector<1x2xf32> to vector<8x2xf32>
    %18 = arith.addf %15, %17 : vector<8x2xf32>
    %cst_13 = arith.constant 5.000000e-01 : f32
    %19 = vector.broadcast %cst_13 : f32 to vector<8x2xf32>
    %20 = arith.mulf %19, %18 : vector<8x2xf32>
    %21 = math.tanh %20 : vector<8x2xf32>
    %cst_14 = arith.constant 5.000000e-01 : f32
    %22 = vector.broadcast %cst_14 : f32 to vector<8x2xf32>
    %23 = arith.mulf %22, %21 : vector<8x2xf32>
    %cst_15 = arith.constant 5.000000e-01 : f32
    %24 = vector.broadcast %cst_15 : f32 to vector<8x2xf32>
    %25 = arith.addf %23, %24 : vector<8x2xf32>
    %c0_16 = arith.constant 0 : index
    %c0_17 = arith.constant 0 : index
    %26 = vector.load %arg6[%c0_16, %c0_17] : memref<8x2xf32, #tpu.memory_space<vmem>>, vector<8x2xf32>
    tpu.vector_store %arg6[%c0_16, %c0_17], %25 {strides = array<i32>} : memref<8x2xf32, #tpu.memory_space<vmem>>, vector<8x2xf32>,
    return
  }
  func.func @transform_0(%arg0: i32) -> (i32, i32) {
    %c0_i32 = arith.constant 0 : i32
    %c0_i32_0 = arith.constant 0 : i32
    return %arg0, %c0_i32 : i32, i32
  }
  func.func @transform_1(%arg0: i32) -> (i32, i32) {
    %c0_i32 = arith.constant 0 : i32
    %c0_i32_0 = arith.constant 0 : i32
    %c0_i32_1 = arith.constant 0 : i32
    return %c0_i32, %c0_i32_0 : i32, i32
  }
  func.func @transform_2(%arg0: i32) -> (i32, i32) {
    %c0_i32 = arith.constant 0 : i32
    %c0_i32_0 = arith.constant 0 : i32
    %c0_i32_1 = arith.constant 0 : i32
    return %c0_i32, %c0_i32_0 : i32, i32
  }
  func.func @transform_3(%arg0: i32) -> (i32, i32) {
    %c0_i32 = arith.constant 0 : i32
    %c0_i32_0 = arith.constant 0 : i32
    %c0_i32_1 = arith.constant 0 : i32
    return %c0_i32, %c0_i32_0 : i32, i32
  }
  func.func @transform_4(%arg0: i32) -> (i32, i32) {
    %c0_i32 = arith.constant 0 : i32
    %c0_i32_0 = arith.constant 0 : i32
    %c0_i32_1 = arith.constant 0 : i32
    return %c0_i32, %c0_i32_0 : i32, i32
  }
  func.func @transform_5(%arg0: i32) -> (i32, i32) {
    %c0_i32 = arith.constant 0 : i32
    %c0_i32_0 = arith.constant 0 : i32
    return %arg0, %c0_i32 : i32, i32
  }
}

</mosaic_0001>

<bundles_post_ra>
// kernel: tpu_custom_call.1
= control target key start
LH: loop header
LB: loop body
LE: loop exit
PB: predicated region body
PF: predicated region fallthrough
CT: control target
= control target key end

     0   :  { %v379_v3 = vmov 0.0|0.0   ;;  %vm380_vm0 = vmmov 0   ;;  %v381_v6 = vmov 0.0   ;;  %vm36_vm1 = vcmask 523264   ;;  %s496_s0 = inlined_call_operand.vmem [shape: f32[4,64], index: 0, kind: input, shape index: {}]   ;;  %s497_s1 = inlined_call_operand.vmem [shape: f32[64,128], index: 1, kind: input, shape index: {}]   ;;  %s498_s2 = inlined_call_operand.vmem [shape: f32[1,128], index: 2, kind: input, shape index: {}]   ;;  %s499_s3 = inlined_call_operand.vmem [shape: f32[128,2], index: 3, kind: input, shape index: {}]   ;;  %s500_s4 = inlined_call_operand.vmem [shape: f32[1,2], index: 4, kind: input, shape index: {}]   ;;  %s501_s5 = inlined_call_operand.vmem [shape: f32[4,2], index: 5, kind: output, shape index: {}]  }
   0x1   :  { %v21_v0 = vld [vmem:[%s497_s1] sm:$0xff]  ;;  %v22_v1 = vld [vmem:[%s497_s1 + $0x8] sm:$0xff]  ;;  %v23_v2 = vld [vmem:[%s497_s1 + $0x10] sm:$0xff]  ;;  %336 = vmatprep.subr.bf16.mxu0 %v379_v3  ;;  %298 = vmatprep.mubr.msk.f32.mxu0 %vm380_vm0, %v381_v6  ;;  %vm212_vm2 = vcmask 15360  }
   0x2   :  { %v337_v4 = vpack.c.bf16 %v22_v1, %v21_v0  ;;  %v24_v5 = vld [vmem:[%s497_s1 + $0x18] sm:$0xff]  ;;  %348 = vmatprep.subr.bf16.mxu1 %v379_v3  ;;  %333 = vmatprep.mubr.msk.f32.mxu1 %vm380_vm0, %v381_v6  ;;  %v115_v8 = vld [vmem:[%s499_s3] sm:$0xff]  ;;  %v116_v9 = vld [vmem:[%s499_s3 + $0x8] sm:$0xff] }
   0x3   :  { %v340_v7 = vpack.c.bf16 %v24_v5, %v23_v2  ;;  %v117_v10 = vld [vmem:[%s499_s3 + $0x10] sm:$0xff]  ;;  %v25_v11 = vld [vmem:[%s497_s1 + $0x20] sm:$0xff]  ;;  %v26_v12 = vld [vmem:[%s497_s1 + $0x28] sm:$0xff]  ;;  %v349_v13 = vpack.c.bf16 %v116_v9, %v115_v8 }
   0x4   :  { %338 = vmatpush3.bf16.msra.mxu0 %v337_v4  ;;  %v118_v14 = vld [vmem:[%s499_s3 + $0x18] sm:$0xff]  ;;  %v343_v16 = vpack.c.bf16 %v26_v12, %v25_v11  ;;  %v119_v17 = vld [vmem:[%s499_s3 + $0x20] sm:$0xff]  ;;  %v120_v18 = vld [vmem:[%s499_s3 + $0x28] sm:$0xff] }
   0x5   :  { %339 = vmatprep.subr.bf16.mxu0 %v379_v3  ;;  %350 = vmatpush3.bf16.msra.mxu1 %v349_v13  ;;  %v352_v15 = vpack.c.bf16 %v118_v14, %v117_v10  ;;  %v27_v19 = vld [vmem:[%s497_s1 + $0x30] sm:$0xff]  ;;  %v28_v20 = vld [vmem:[%s497_s1 + $0x38] sm:$0xff]  ;;  %v355_v21 = vpack.c.bf16 %v120_v18, %v119_v17  ;;  %v20_v23 = vld [vmem:[%s496_s0] sm:$0xff] }
   0x6   :  { %351 = vmatprep.subr.bf16.mxu1 %v379_v3  ;;  %v346_v22 = vpack.c.bf16 %v28_v20, %v27_v19  ;;  %v121_v24 = vld [vmem:[%s499_s3 + $0x30] sm:$0xff]  ;;  %v122_v25 = vld [vmem:[%s499_s3 + $0x38] sm:$0xff]  ;;  %v123_v27 = vld [vmem:[%s499_s3 + $0x40] sm:$0xff] }
   0x7   :  { %v358_v26 = vpack.c.bf16 %v122_v25, %v121_v24  ;;  %v124_v28 = vld [vmem:[%s499_s3 + $0x48] sm:$0xff]  ;;  %v125_v30 = vld [vmem:[%s499_s3 + $0x50] sm:$0xff]  ;;  %v126_v31 = vld [vmem:[%s499_s3 + $0x58] sm:$0xff] }
   0x8   :  { %341 = vmatpush3.bf16.msra.mxu0 %v340_v7  ;;  %v361_v29 = vpack.c.bf16 %v124_v28, %v123_v27  ;;  %v364_v32 = vpack.c.bf16 %v126_v31, %v125_v30  ;;  %v127_v33 = vld [vmem:[%s499_s3 + $0x60] sm:$0xff]  ;;  %v128_v34 = vld [vmem:[%s499_s3 + $0x68] sm:$0xff]  ;;  %v129_v36 = vld [vmem:[%s499_s3 + $0x70] sm:$0xff] }
   0x9   :  { %342 = vmatprep.subr.bf16.mxu0 %v379_v3  ;;  %353 = vmatpush3.bf16.msra.mxu1 %v352_v15  ;;  %v367_v35 = vpack.c.bf16 %v128_v34, %v127_v33  ;;  %v130_v37 = vld [vmem:[%s499_s3 + $0x78] sm:$0xff]  ;;  %v253_v39 = vld [vmem:[%s498_s2] ss:$0 sm:$0xff] }
   0xa   :  { %354 = vmatprep.subr.bf16.mxu1 %v379_v3  ;;  %v370_v38 = vpack.c.bf16 %v130_v37, %v129_v36  ;;  %v255_v48 = vld [vmem:[%s500_s4] ss:$0 sm:$0xff] }
   0xc   :  { %344 = vmatpush3.bf16.msra.mxu0 %v343_v16 }
   0xd   :  { %345 = vmatprep.subr.bf16.mxu0 %v379_v3  ;;  %356 = vmatpush3.bf16.msra.mxu1 %v355_v21 }
   0xe   :  { %357 = vmatprep.subr.bf16.mxu1 %v379_v3 }
  0x10   :  { %347 = vmatpush3.bf16.msra.mxu0 %v346_v22 }
  0x11   :  { %359 = vmatpush3.bf16.msra.mxu1 %v358_v26 }
  0x12   :  { %360 = vmatprep.subr.bf16.mxu1 %v379_v3 }
  0x13   :  { %299 = vmatmul.mubr.msk.f32.vlgmr.msra.gmra.mrb[0].mxu0 %vm36_vm1, %v20_v23 }
  0x15   :  { %362 = vmatpush3.bf16.msra.mxu1 %v361_v29 }
  0x16   :  { %363 = vmatprep.subr.bf16.mxu1 %v379_v3 }
  0x19   :  { %365 = vmatpush3.bf16.msra.mxu1 %v364_v32 }
  0x1a   :  { %366 = vmatprep.subr.bf16.mxu1 %v379_v3 }
  0x1d   :  { %368 = vmatpush3.bf16.msra.mxu1 %v367_v35 }
  0x1e   :  { %369 = vmatprep.subr.bf16.mxu1 %v379_v3 }
  0x21   :  { %371 = vmatpush3.bf16.msra.mxu1 %v370_v38 }
  0xe6   :  { %v106_v40 = vpop.f32.mrb[0].mxu0 }
  0xe7   :  { %v107_v41 = vadd.f32 %v253_v39, %v106_v40  ;;  %v300_v42 = vpop.f32.mrb[1].mxu0 }
  0xe9   :  { %v110_v43 = vmul.f32 0.5, %v107_v41 }
  0xeb   :  { %375 = vtanh.f32 %v110_v43 }
  0xf5   :  { %v376_v44 = vpop.eup %375 }
  0xf6   :  { %v112_v45 = vmul.f32 0.5, %v376_v44 }
  0xf8   :  { %v113_v46 = vadd.f32 0.5, %v112_v45 }
  0xfa   :  { %v114_v47 = vmul.f32 %v113_v46, %v107_v41 }
  0xfc   :  { %334 = vmatmul.mubr.f32.vlgmr.msra.gmra.mrb[0].mxu1 %v114_v47 }
 0x1cf   :  { %v204_v49 = vpop.f32.mrb[0].mxu1 }
 0x1d0   :  { %v205_v50 = vadd.f32 %v255_v48, %v204_v49  ;;  %v335_v51 = vpop.f32.mrb[1].mxu1 }
 0x1d2   :  { %v208_v52 = vmul.f32 0.5, %v205_v50 }
 0x1d4   :  { %377 = vtanh.f32 %v208_v52 }
 0x1de   :  { %v378_v53 = vpop.eup %377 }
 0x1df   :  { %v210_v54 = vmul.f32 0.5, %v378_v53 }
 0x1e1   :  { %v211_v55 = vadd.f32 0.5, %v210_v54 }
 0x1e3   :  { %213 = vst.msk [vmem:[#allocation2] sm:$0xff] %vm212_vm2, %v211_v55 }
 0x1ea   :  { %v231_v56 = vld [vmem:[#allocation2] sm:$0xf] }
 0x1eb   :  { %232 = vst [vmem:[%s501_s5] sm:$0xf] %v231_v56 }

</bundles_post_ra>
